<compile_context>
chip_gen: v6e
topology: v6e:2x2x1
jax: 0.10.0
libtpu: 0.0.40
codegen_flags: <defaults>
</compile_context>

<pallas_src>
import functools

import jax
import jax.numpy as jnp
from jax.experimental import pallas as pl
from jax.experimental.pallas import tpu as pltpu


_LANE = 512           # lane-dense last dim (multiple of 128 -> unmasked vst)
_MAX_TILE_ROWS = 256  # 256 x 512 x 4B = 512 KiB per f32 input tile

_SELU_ALPHA = 1.6732632423543772848170429916717
_SELU_SCALE = 1.0507009873554804934193349852946


def _act_kernel(x_ref, o_ref, *, relu_type):
    """Elementwise activation on one (tile_rows, _LANE) block (VPU/EUP only)."""
    x = x_ref[...]
    if relu_type == "relu":
        y = jnp.maximum(x, jnp.zeros((), x.dtype))
    elif relu_type == "leakyrelu":
        y = jnp.where(x >= 0, x, jnp.asarray(0.2, x.dtype) * x)
    elif relu_type == "selu":
        xf = x.astype(jnp.float32)
        y = _SELU_SCALE * jnp.where(xf >= 0, xf, _SELU_ALPHA * (jnp.exp(xf) - 1.0))
    else:  # "none": plain copy (the wrapper short-circuits this case)
        y = x
    o_ref[...] = y.astype(o_ref.dtype)


def _prelu_kernel(x_ref, a_ref, o_ref):
    """PReLU with a pre-broadcast per-element slope tile."""
    x = x_ref[...]
    a = a_ref[...]
    o_ref[...] = jnp.where(x >= 0, x, a * x).astype(o_ref.dtype)


def _round_up(a, b):
    return ((a + b - 1) // b) * b


def _to_lane_dense_2d(flat, lane, max_tile_rows):
    """Pad a flat array and view it as (rows_padded, lane). Returns (x2d, tile_rows)."""
    total = flat.shape[0]
    rows = pl.cdiv(total, lane)
    tile_rows = min(max_tile_rows, _round_up(rows, 8))   # rows per grid step, mult of 8
    rows_padded = _round_up(rows, tile_rows)
    flat = jnp.pad(flat, (0, rows_padded * lane - total))
    return flat.reshape(rows_padded, lane), tile_rows


@functools.partial(jax.jit, static_argnames=("relu_type",))
def relu_layer_forward(x, prelu_weight=None, relu_type="relu"):
    """ReluLayer.forward(x).

    x            : any shape (e.g. (B, C, H, W)), any float dtype.
    prelu_weight : (C,) per-channel slope, only used when relu_type='prelu'
                   (x is then assumed NCHW with x.shape[1] == C).
    """
    relu_type = relu_type.lower()
    if relu_type == "none":
        return x  # identity, exactly like the PyTorch module

    orig_shape = x.shape
    total = x.size
    x2d, tile_rows = _to_lane_dense_2d(x.reshape(-1), _LANE, _MAX_TILE_ROWS)
    rows_padded = x2d.shape[0]
    grid = (rows_padded // tile_rows,)

    block = pl.BlockSpec((tile_rows, _LANE), lambda i: (i, 0))
    cparams = pltpu.CompilerParams(dimension_semantics=("parallel",))

    if relu_type == "prelu":
        assert prelu_weight is not None, "prelu requires a per-channel weight"
        a_full = jnp.broadcast_to(
            prelu_weight.astype(x.dtype)[None, :, None, None], orig_shape
        ).reshape(-1)
        a2d, _ = _to_lane_dense_2d(a_full, _LANE, _MAX_TILE_ROWS)
        out2d = pl.pallas_call(
            _prelu_kernel,
            out_shape=jax.ShapeDtypeStruct(x2d.shape, x.dtype),
            grid_spec=pltpu.PrefetchScalarGridSpec(
                num_scalar_prefetch=0,
                grid=grid,
                in_specs=[block, block],
                out_specs=block,
            ),
            compiler_params=cparams,
        )(x2d, a2d)
    elif relu_type in ("relu", "leakyrelu", "selu"):
        out2d = pl.pallas_call(
            functools.partial(_act_kernel, relu_type=relu_type),
            out_shape=jax.ShapeDtypeStruct(x2d.shape, x.dtype),
            grid_spec=pltpu.PrefetchScalarGridSpec(
                num_scalar_prefetch=0,
                grid=grid,
                in_specs=[block],
                out_specs=block,
            ),
            compiler_params=cparams,
        )(x2d)
    else:
        raise ValueError("Relu type {} not support.".format(relu_type))

    return out2d.reshape(-1)[:total].reshape(orig_shape)


if __name__ == "__main__":
    # Small shapes consistent with the module: batch=2, channels=4, 16x16 spatial.
    B, C, H, W = 2, 4, 16, 16
    key = jax.random.PRNGKey(0)
    kx, _ = jax.random.split(key)
    x = jax.random.normal(kx, (B, C, H, W), dtype=jnp.float32)

    # Default config: relu_type='relu'
    out = jax.block_until_ready(relu_layer_forward(x, relu_type="relu"))
    assert out.shape == (B, C, H, W), out.shape
    assert jnp.allclose(out, jnp.maximum(x, 0.0)), "relu mismatch"

    # Other supported variants (cheap sanity checks at the same small shape).
    out_lr = jax.block_until_ready(relu_layer_forward(x, relu_type="leakyrelu"))
    assert jnp.allclose(out_lr, jnp.where(x >= 0, x, 0.2 * x), atol=1e-6)

    alpha = jnp.full((C,), 0.25, jnp.float32)  # PyTorch PReLU default init
    out_pr = jax.block_until_ready(relu_layer_forward(x, alpha, relu_type="prelu"))
    ref_pr = jnp.where(x >= 0, x, alpha[None, :, None, None] * x)
    assert jnp.allclose(out_pr, ref_pr, atol=1e-6)

    out_se = jax.block_until_ready(relu_layer_forward(x, relu_type="selu"))
    ref_se = _SELU_SCALE * jnp.where(x >= 0, x, _SELU_ALPHA * (jnp.exp(x) - 1.0))
    assert jnp.allclose(out_se, ref_se, atol=1e-5, rtol=1e-5)

    out_id = jax.block_until_ready(relu_layer_forward(x, relu_type="none"))
    assert jnp.allclose(out_id, x)

    print("KERNEL_OK")
</pallas_src>

<mosaic_0001>
module attributes {stable_mosaic.version = 11 : i64} {
  func.func @_act_kernel(%arg0: i32, %arg1: memref<8x512xf32, #tpu.memory_space<vmem>>, %arg2: memref<8x512xf32, #tpu.memory_space<vmem>>) attributes {dimension_semantics = [#tpu.dimension_semantics<parallel>], iteration_bounds = array<i64: 1>, scalar_prefetch = 0 : i64, scratch_operands = 0 : i64, tpu.core_type = #tpu.core_type<tc>, window_params = [{transform_indices = @transform_0, window_bounds = array<i64: 8, 512>}, {transform_indices = @transform_1, window_bounds = array<i64: 8, 512>}]} {
    %c0 = arith.constant 0 : index
    %c0_0 = arith.constant 0 : index
    %0 = vector.load %arg1[%c0, %c0_0] : memref<8x512xf32, #tpu.memory_space<vmem>>, vector<8x512xf32>
    %cst = arith.constant 0.000000e+00 : f32
    %1 = vector.broadcast %cst : f32 to vector<8x512xf32>
    %2 = arith.maximumf %0, %1 : vector<8x512xf32>
    %c0_1 = arith.constant 0 : index
    %c0_2 = arith.constant 0 : index
    %3 = vector.load %arg2[%c0_1, %c0_2] : memref<8x512xf32, #tpu.memory_space<vmem>>, vector<8x512xf32>
    tpu.vector_store %arg2[%c0_1, %c0_2], %2 {strides = array<i32>} : memref<8x512xf32, #tpu.memory_space<vmem>>, vector<8x512xf32>,
    return
  }
  func.func @transform_0(%arg0: i32) -> (i32, i32) {
    %c0_i32 = arith.constant 0 : i32
    %c0_i32_0 = arith.constant 0 : i32
    return %arg0, %c0_i32 : i32, i32
  }
  func.func @transform_1(%arg0: i32) -> (i32, i32) {
    %c0_i32 = arith.constant 0 : i32
    %c0_i32_0 = arith.constant 0 : i32
    return %arg0, %c0_i32 : i32, i32
  }
}

</mosaic_0001>

<bundles_post_ra>
// kernel: relu_layer_forward.1
= control target key start
LH: loop header
LB: loop body
LE: loop exit
PB: predicated region body
PF: predicated region fallthrough
CT: control target
= control target key end

     0   :  { %s58_s0 = inlined_call_operand.vmem [shape: f32[8,512], index: 0, kind: input, shape index: {}]   ;;  %s59_s1 = inlined_call_operand.vmem [shape: f32[8,512], index: 1, kind: output, shape index: {}]  }
   0x1   :  { %v8_v0 = vld [vmem:[%s58_s0] sm:$0xff]  ;;  %v9_v1 = vld [vmem:[%s58_s0 + $0x8] sm:$0xff]  ;;  %v10_v2 = vld [vmem:[%s58_s0 + $0x10] sm:$0xff] }
   0x2   :  { %v12_v3 = vmax.f32 %v8_v0, 0.0  ;;  %v13_v4 = vmax.f32 %v9_v1, 0.0  ;;  %v14_v5 = vmax.f32 %v10_v2, 0.0  ;;  %v11_v6 = vld [vmem:[%s58_s0 + $0x18] sm:$0xff] }
   0x3   :  { %v15_v7 = vmax.f32 %v11_v6, 0.0 }
   0x4   :  { %16 = vst [vmem:[%s59_s1] sm:$0xff] %v12_v3  ;;  %17 = vst [vmem:[%s59_s1 + $0x8] sm:$0xff] %v13_v4 }
   0x5   :  { %18 = vst [vmem:[%s59_s1 + $0x10] sm:$0xff] %v14_v5  ;;  %19 = vst [vmem:[%s59_s1 + $0x18] sm:$0xff] %v15_v7 }

</bundles_post_ra>
